<compile_context>
chip_gen: v6e
topology: v6e:2x2x1
jax: 0.10.0
libtpu: 0.0.40
codegen_flags: <defaults>
</compile_context>

<pallas_src>
import numpy as np
import jax
import jax.numpy as jnp
from jax.experimental import pallas as pl
from jax.experimental.pallas import tpu as pltpu

# ----------------------------- configuration -------------------------------
B = 2                        # batch
N_TOK = 64                   # number of tokens (e.g. an 8x8 latent)
HIDDEN = 32                  # hidden_size
PATCH = 2                    # patch_size
OUT_CH = 32                  # out_channels
OUT_DIM = PATCH * PATCH * OUT_CH   # = 128 -> lane-dense output stores
LN_EPS = 1e-6


# ------------------------------- kernel ------------------------------------
def final_layer_kernel(x_ref, c_ref, w_ada_ref, b_ada_ref,
                       w_lin_ref, b_lin_ref, o_ref):
    # x_ref: (BB, N, C)   c_ref: (BB, 1, C)   o_ref: (BB*N, OUT)
    BB, N, C = x_ref.shape

    w_lin = w_lin_ref[...]            # (C, OUT) bf16
    b_lin = b_lin_ref[...]            # (1, OUT) f32
    w_ada = w_ada_ref[...]            # (C, 2C) f32
    b_ada = b_ada_ref[...]            # (1, 2C) f32

    parts = []
    for b in range(BB):               # static unroll; BB is 1 or B (tiny)
        cb = c_ref[b]                 # (1, C), static first-axis index
        # adaLN_modulation: Linear(SiLU(c)) -> (1, 2C), chunk into shift/scale
        silu_c = cb * jax.nn.sigmoid(cb)
        ada = jnp.dot(silu_c, w_ada,
                      preferred_element_type=jnp.float32) + b_ada
        shift = ada[:, :C]                       # (1, C)
        one_plus_scale = 1.0 + ada[:, C:]        # (1, C), hoisted, used once

        # LayerNorm (no affine) over the channel axis
        xb = x_ref[b]                            # (N, C)
        mu = jnp.mean(xb, axis=-1, keepdims=True)
        var = jnp.mean((xb - mu) ** 2, axis=-1, keepdims=True)
        xn = (xb - mu) * jax.lax.rsqrt(var + LN_EPS)

        parts.append(xn * one_plus_scale + shift)          # modulate

    # Stack batches along the sublane axis (64-row, 8-aligned chunks) so the
    # final linear is a single M = BB*N matmul (M = 128 on the folded path).
    xm = parts[0] if BB == 1 else jnp.concatenate(parts, axis=0)   # (BB*N, C)

    # Final linear: bf16 operands on the MXU, f32 accumulation, lane-dense out.
    out = jnp.dot(xm.astype(w_lin.dtype), w_lin,
                  preferred_element_type=jnp.float32) + b_lin
    o_ref[...] = out


# ------------------------------ wrapper -------------------------------------
def final_layer_forward(x, c, p, fold_batch=None):
    if fold_batch is None:
        # v7x has 2 TensorCores -> keep a "parallel" batch grid (megacore).
        # v5e/v6e (single TC) -> fold batch into one grid step (fills MXU rows,
        # saves per-grid-step overhead).  Probe defensively; default to fold.
        try:
            kind = jax.devices()[0].device_kind.lower()
            fold_batch = "v7" not in kind
        except Exception:
            fold_batch = True

    c3 = c.reshape(B, 1, HIDDEN)      # trailing (1, C) keeps blocks full-dim
    weights = (p["w_ada"], p["b_ada"], p["w_lin"], p["b_lin"])

    if fold_batch:
        grid = (1,)
        x_spec = pl.BlockSpec((B, N_TOK, HIDDEN), lambda i: (0, 0, 0))
        c_spec = pl.BlockSpec((B, 1, HIDDEN), lambda i: (0, 0, 0))
        o_spec = pl.BlockSpec((B * N_TOK, OUT_DIM), lambda i: (0, 0))
        semantics = ("arbitrary",)
    else:
        grid = (B,)
        x_spec = pl.BlockSpec((1, N_TOK, HIDDEN), lambda i: (i, 0, 0))
        c_spec = pl.BlockSpec((1, 1, HIDDEN), lambda i: (i, 0, 0))
        o_spec = pl.BlockSpec((N_TOK, OUT_DIM), lambda i: (i, 0))
        semantics = ("parallel",)

    # Weights: full-array blocks, same tile every grid step.
    w_specs = [pl.BlockSpec(w.shape, lambda i, _z=(0,) * w.ndim: _z)
               for w in weights]

    out2d = pl.pallas_call(
        final_layer_kernel,
        out_shape=jax.ShapeDtypeStruct((B * N_TOK, OUT_DIM), jnp.float32),
        grid_spec=pltpu.PrefetchScalarGridSpec(
            num_scalar_prefetch=0,
            grid=grid,
            in_specs=[x_spec, c_spec] + w_specs,
            out_specs=o_spec,
        ),
        compiler_params=pltpu.CompilerParams(dimension_semantics=semantics),
    )(x, c3, *weights)
    return out2d.reshape(B, N_TOK, OUT_DIM)


# -------------------- deterministic example parameters ----------------------
def make_params(key):
    ks = jax.random.split(key, 4)

    def nrm(k, shape, std=0.02):
        return (std * jax.random.normal(k, shape)).astype(jnp.float32)

    return {
        "w_ada": nrm(ks[0], (HIDDEN, 2 * HIDDEN)),
        "b_ada": nrm(ks[1], (1, 2 * HIDDEN)),
        # final linear weight stored bf16 (MXU-native); bias stays f32
        "w_lin": nrm(ks[2], (HIDDEN, OUT_DIM)).astype(jnp.bfloat16),
        "b_lin": nrm(ks[3], (1, OUT_DIM)),
    }


# ---------------------------- pure-JAX reference ----------------------------
def final_layer_reference(x, c, p):
    silu_c = c * jax.nn.sigmoid(c)
    ada = silu_c @ p["w_ada"] + p["b_ada"]                  # (B, 2C)
    shift, scale = jnp.split(ada, 2, axis=1)
    mu = jnp.mean(x, -1, keepdims=True)
    var = jnp.mean((x - mu) ** 2, -1, keepdims=True)
    xn = (x - mu) * jax.lax.rsqrt(var + LN_EPS)
    xm = xn * (1.0 + scale[:, None, :]) + shift[:, None, :]
    return xm @ p["w_lin"].astype(jnp.float32) + p["b_lin"]


# --------------------------------- main --------------------------------------
if __name__ == "__main__":
    key = jax.random.PRNGKey(0)
    kx, kc, kp = jax.random.split(key, 3)
    x = jax.random.normal(kx, (B, N_TOK, HIDDEN), jnp.float32)
    c = jax.random.normal(kc, (B, HIDDEN), jnp.float32)
    params = make_params(kp)

    out = jax.block_until_ready(final_layer_forward(x, c, params))
    ref = final_layer_reference(x, c, params)
    np.testing.assert_allclose(np.asarray(out), np.asarray(ref),
                               rtol=1e-2, atol=1e-2)
    print("KERNEL_OK")
</pallas_src>

<mosaic_0001>
module attributes {stable_mosaic.version = 11 : i64} {
  func.func @final_layer_kernel(%arg0: i32, %arg1: memref<2x64x32xf32, #tpu.memory_space<vmem>>, %arg2: memref<2x1x32xf32, #tpu.memory_space<vmem>>, %arg3: memref<32x64xf32, #tpu.memory_space<vmem>>, %arg4: memref<1x64xf32, #tpu.memory_space<vmem>>, %arg5: memref<32x128xbf16, #tpu.memory_space<vmem>>, %arg6: memref<1x128xf32, #tpu.memory_space<vmem>>, %arg7: memref<128x128xf32, #tpu.memory_space<vmem>>) attributes {dimension_semantics = [#tpu.dimension_semantics<arbitrary>], iteration_bounds = array<i64: 1>, scalar_prefetch = 0 : i64, scratch_operands = 0 : i64, tpu.core_type = #tpu.core_type<tc>, window_params = [{pipeline_mode = #tpu.pipeline_mode<synchronous>, transform_indices = @transform_0, window_bounds = array<i64: 2, 64, 32>}, {pipeline_mode = #tpu.pipeline_mode<synchronous>, transform_indices = @transform_1, window_bounds = array<i64: 2, 1, 32>}, {pipeline_mode = #tpu.pipeline_mode<synchronous>, transform_indices = @transform_2, window_bounds = array<i64: 32, 64>}, {pipeline_mode = #tpu.pipeline_mode<synchronous>, transform_indices = @transform_3, window_bounds = array<i64: 1, 64>}, {pipeline_mode = #tpu.pipeline_mode<synchronous>, transform_indices = @transform_4, window_bounds = array<i64: 32, 128>}, {pipeline_mode = #tpu.pipeline_mode<synchronous>, transform_indices = @transform_5, window_bounds = array<i64: 1, 128>}, {pipeline_mode = #tpu.pipeline_mode<synchronous>, transform_indices = @transform_6, window_bounds = array<i64: 128, 128>}]} {
    %c0 = arith.constant 0 : index
    %c0_0 = arith.constant 0 : index
    %0 = vector.load %arg5[%c0, %c0_0] : memref<32x128xbf16, #tpu.memory_space<vmem>>, vector<32x128xbf16>
    %c0_1 = arith.constant 0 : index
    %c0_2 = arith.constant 0 : index
    %1 = vector.load %arg6[%c0_1, %c0_2] : memref<1x128xf32, #tpu.memory_space<vmem>>, vector<1x128xf32>
    %c0_3 = arith.constant 0 : index
    %c0_4 = arith.constant 0 : index
    %2 = vector.load %arg3[%c0_3, %c0_4] : memref<32x64xf32, #tpu.memory_space<vmem>>, vector<32x64xf32>
    %c0_5 = arith.constant 0 : index
    %c0_6 = arith.constant 0 : index
    %3 = vector.load %arg4[%c0_5, %c0_6] : memref<1x64xf32, #tpu.memory_space<vmem>>, vector<1x64xf32>
    %c0_7 = arith.constant 0 : index
    %c0_8 = arith.constant 0 : index
    %c0_9 = arith.constant 0 : index
    %4 = vector.load %arg2[%c0_7, %c0_8, %c0_9] : memref<2x1x32xf32, #tpu.memory_space<vmem>>, vector<1x1x32xf32>
    %5 = vector.shape_cast %4 : vector<1x1x32xf32> to vector<1x32xf32>
    %6 = arith.negf %5 : vector<1x32xf32>
    %7 = math.exp %6 : vector<1x32xf32>
    %cst = arith.constant 1.000000e+00 : f32
    %8 = vector.broadcast %cst : f32 to vector<1x32xf32>
    %9 = arith.addf %8, %7 : vector<1x32xf32>
    %10 = arith.divf %8, %9 : vector<1x32xf32>
    %11 = arith.mulf %5, %10 : vector<1x32xf32>
    %cst_10 = arith.constant dense<0.000000e+00> : vector<1x64xf32>
    %12 = tpu.matmul %11, %2, %cst_10 {dimension_numbers = #tpu.dot_dimension_numbers<[1], [0], [0], [1], [0, 0, 1, 1], [], []>} : vector<1x32xf32>, vector<32x64xf32>, vector<1x64xf32> -> vector<1x64xf32>
    %13 = arith.addf %12, %3 : vector<1x64xf32>
    %14 = vector.extract_strided_slice %13 {offsets = [0, 0], sizes = [1, 32], strides = [1, 1]} : vector<1x64xf32> to vector<1x32xf32>
    %15 = vector.extract_strided_slice %13 {offsets = [0, 32], sizes = [1, 32], strides = [1, 1]} : vector<1x64xf32> to vector<1x32xf32>
    %cst_11 = arith.constant 1.000000e+00 : f32
    %16 = vector.broadcast %cst_11 : f32 to vector<1x32xf32>
    %17 = arith.addf %16, %15 : vector<1x32xf32>
    %c0_12 = arith.constant 0 : index
    %c0_13 = arith.constant 0 : index
    %c0_14 = arith.constant 0 : index
    %18 = vector.load %arg1[%c0_12, %c0_13, %c0_14] : memref<2x64x32xf32, #tpu.memory_space<vmem>>, vector<1x64x32xf32>
    %19 = vector.shape_cast %18 : vector<1x64x32xf32> to vector<64x32xf32>
    %cst_15 = arith.constant dense<0.000000e+00> : vector<64xf32>
    %20 = vector.multi_reduction <add>, %19, %cst_15 [1] : vector<64x32xf32> to vector<64xf32>
    %21 = vector.shape_cast %20 : vector<64xf32> to vector<64x1xf32>
    %cst_16 = arith.constant 3.200000e+01 : f32
    %22 = vector.broadcast %cst_16 : f32 to vector<64x1xf32>
    %23 = arith.divf %21, %22 : vector<64x1xf32>
    %24 = vector.broadcast %23 : vector<64x1xf32> to vector<64x32xf32>
    %25 = arith.subf %19, %24 : vector<64x32xf32>
    %26 = arith.mulf %25, %25 : vector<64x32xf32>
    %cst_17 = arith.constant dense<0.000000e+00> : vector<64xf32>
    %27 = vector.multi_reduction <add>, %26, %cst_17 [1] : vector<64x32xf32> to vector<64xf32>
    %28 = vector.shape_cast %27 : vector<64xf32> to vector<64x1xf32>
    %cst_18 = arith.constant 3.200000e+01 : f32
    %29 = vector.broadcast %cst_18 : f32 to vector<64x1xf32>
    %30 = arith.divf %28, %29 : vector<64x1xf32>
    %31 = vector.broadcast %23 : vector<64x1xf32> to vector<64x32xf32>
    %32 = arith.subf %19, %31 : vector<64x32xf32>
    %cst_19 = arith.constant 9.99999997E-7 : f32
    %33 = vector.broadcast %cst_19 : f32 to vector<64x1xf32>
    %34 = arith.addf %30, %33 : vector<64x1xf32>
    %35 = math.rsqrt %34 : vector<64x1xf32>
    %36 = vector.broadcast %35 : vector<64x1xf32> to vector<64x32xf32>
    %37 = arith.mulf %32, %36 : vector<64x32xf32>
    %38 = vector.broadcast %17 : vector<1x32xf32> to vector<64x32xf32>
    %39 = arith.mulf %37, %38 : vector<64x32xf32>
    %40 = vector.broadcast %14 : vector<1x32xf32> to vector<64x32xf32>
    %41 = arith.addf %39, %40 : vector<64x32xf32>
    %c1 = arith.constant 1 : index
    %c0_20 = arith.constant 0 : index
    %c0_21 = arith.constant 0 : index
    %42 = vector.load %arg2[%c1, %c0_20, %c0_21] : memref<2x1x32xf32, #tpu.memory_space<vmem>>, vector<1x1x32xf32>
    %43 = vector.shape_cast %42 : vector<1x1x32xf32> to vector<1x32xf32>
    %44 = arith.negf %43 : vector<1x32xf32>
    %45 = math.exp %44 : vector<1x32xf32>
    %cst_22 = arith.constant 1.000000e+00 : f32
    %46 = vector.broadcast %cst_22 : f32 to vector<1x32xf32>
    %47 = arith.addf %46, %45 : vector<1x32xf32>
    %48 = arith.divf %46, %47 : vector<1x32xf32>
    %49 = arith.mulf %43, %48 : vector<1x32xf32>
    %cst_23 = arith.constant dense<0.000000e+00> : vector<1x64xf32>
    %50 = tpu.matmul %49, %2, %cst_23 {dimension_numbers = #tpu.dot_dimension_numbers<[1], [0], [0], [1], [0, 0, 1, 1], [], []>} : vector<1x32xf32>, vector<32x64xf32>, vector<1x64xf32> -> vector<1x64xf32>
    %51 = arith.addf %50, %3 : vector<1x64xf32>
    %52 = vector.extract_strided_slice %51 {offsets = [0, 0], sizes = [1, 32], strides = [1, 1]} : vector<1x64xf32> to vector<1x32xf32>
    %53 = vector.extract_strided_slice %51 {offsets = [0, 32], sizes = [1, 32], strides = [1, 1]} : vector<1x64xf32> to vector<1x32xf32>
    %cst_24 = arith.constant 1.000000e+00 : f32
    %54 = vector.broadcast %cst_24 : f32 to vector<1x32xf32>
    %55 = arith.addf %54, %53 : vector<1x32xf32>
    %c1_25 = arith.constant 1 : index
    %c0_26 = arith.constant 0 : index
    %c0_27 = arith.constant 0 : index
    %56 = vector.load %arg1[%c1_25, %c0_26, %c0_27] : memref<2x64x32xf32, #tpu.memory_space<vmem>>, vector<1x64x32xf32>
    %57 = vector.shape_cast %56 : vector<1x64x32xf32> to vector<64x32xf32>
    %cst_28 = arith.constant dense<0.000000e+00> : vector<64xf32>
    %58 = vector.multi_reduction <add>, %57, %cst_28 [1] : vector<64x32xf32> to vector<64xf32>
    %59 = vector.shape_cast %58 : vector<64xf32> to vector<64x1xf32>
    %cst_29 = arith.constant 3.200000e+01 : f32
    %60 = vector.broadcast %cst_29 : f32 to vector<64x1xf32>
    %61 = arith.divf %59, %60 : vector<64x1xf32>
    %62 = vector.broadcast %61 : vector<64x1xf32> to vector<64x32xf32>
    %63 = arith.subf %57, %62 : vector<64x32xf32>
    %64 = arith.mulf %63, %63 : vector<64x32xf32>
    %cst_30 = arith.constant dense<0.000000e+00> : vector<64xf32>
    %65 = vector.multi_reduction <add>, %64, %cst_30 [1] : vector<64x32xf32> to vector<64xf32>
    %66 = vector.shape_cast %65 : vector<64xf32> to vector<64x1xf32>
    %cst_31 = arith.constant 3.200000e+01 : f32
    %67 = vector.broadcast %cst_31 : f32 to vector<64x1xf32>
    %68 = arith.divf %66, %67 : vector<64x1xf32>
    %69 = vector.broadcast %61 : vector<64x1xf32> to vector<64x32xf32>
    %70 = arith.subf %57, %69 : vector<64x32xf32>
    %cst_32 = arith.constant 9.99999997E-7 : f32
    %71 = vector.broadcast %cst_32 : f32 to vector<64x1xf32>
    %72 = arith.addf %68, %71 : vector<64x1xf32>
    %73 = math.rsqrt %72 : vector<64x1xf32>
    %74 = vector.broadcast %73 : vector<64x1xf32> to vector<64x32xf32>
    %75 = arith.mulf %70, %74 : vector<64x32xf32>
    %76 = vector.broadcast %55 : vector<1x32xf32> to vector<64x32xf32>
    %77 = arith.mulf %75, %76 : vector<64x32xf32>
    %78 = vector.broadcast %52 : vector<1x32xf32> to vector<64x32xf32>
    %79 = arith.addf %77, %78 : vector<64x32xf32>
    %80 = tpu.concatenate %41, %79 in 0 : vector<64x32xf32>, vector<64x32xf32> -> vector<128x32xf32>
    %81 = arith.truncf %80 : vector<128x32xf32> to vector<128x32xbf16>
    %cst_33 = arith.constant dense<0.000000e+00> : vector<128x128xf32>
    %82 = tpu.matmul %81, %0, %cst_33 {dimension_numbers = #tpu.dot_dimension_numbers<[1], [0], [0], [1], [0, 0, 1, 1], [], []>} : vector<128x32xbf16>, vector<32x128xbf16>, vector<128x128xf32> -> vector<128x128xf32>
    %83 = vector.broadcast %1 : vector<1x128xf32> to vector<128x128xf32>
    %84 = arith.addf %82, %83 : vector<128x128xf32>
    %c0_34 = arith.constant 0 : index
    %c0_35 = arith.constant 0 : index
    %85 = vector.load %arg7[%c0_34, %c0_35] : memref<128x128xf32, #tpu.memory_space<vmem>>, vector<128x128xf32>
    tpu.vector_store %arg7[%c0_34, %c0_35], %84 {strides = array<i32>} : memref<128x128xf32, #tpu.memory_space<vmem>>, vector<128x128xf32>,
    return
  }
  func.func @transform_0(%arg0: i32) -> (i32, i32, i32) {
    %c0_i32 = arith.constant 0 : i32
    %c0_i32_0 = arith.constant 0 : i32
    %c0_i32_1 = arith.constant 0 : i32
    %c0_i32_2 = arith.constant 0 : i32
    return %c0_i32, %c0_i32_0, %c0_i32_1 : i32, i32, i32
  }
  func.func @transform_1(%arg0: i32) -> (i32, i32, i32) {
    %c0_i32 = arith.constant 0 : i32
    %c0_i32_0 = arith.constant 0 : i32
    %c0_i32_1 = arith.constant 0 : i32
    %c0_i32_2 = arith.constant 0 : i32
    return %c0_i32, %c0_i32_0, %c0_i32_1 : i32, i32, i32
  }
  func.func @transform_2(%arg0: i32) -> (i32, i32) {
    %c0_i32 = arith.constant 0 : i32
    %c0_i32_0 = arith.constant 0 : i32
    %c0_i32_1 = arith.constant 0 : i32
    return %c0_i32, %c0_i32_0 : i32, i32
  }
  func.func @transform_3(%arg0: i32) -> (i32, i32) {
    %c0_i32 = arith.constant 0 : i32
    %c0_i32_0 = arith.constant 0 : i32
    %c0_i32_1 = arith.constant 0 : i32
    return %c0_i32, %c0_i32_0 : i32, i32
  }
  func.func @transform_4(%arg0: i32) -> (i32, i32) {
    %c0_i32 = arith.constant 0 : i32
    %c0_i32_0 = arith.constant 0 : i32
    %c0_i32_1 = arith.constant 0 : i32
    return %c0_i32, %c0_i32_0 : i32, i32
  }
  func.func @transform_5(%arg0: i32) -> (i32, i32) {
    %c0_i32 = arith.constant 0 : i32
    %c0_i32_0 = arith.constant 0 : i32
    %c0_i32_1 = arith.constant 0 : i32
    return %c0_i32, %c0_i32_0 : i32, i32
  }
  func.func @transform_6(%arg0: i32) -> (i32, i32) {
    %c0_i32 = arith.constant 0 : i32
    %c0_i32_0 = arith.constant 0 : i32
    %c0_i32_1 = arith.constant 0 : i32
    return %c0_i32, %c0_i32_0 : i32, i32
  }
}

</mosaic_0001>

<bundles_post_ra>
// kernel: tpu_custom_call.1
= control target key start
LH: loop header
LB: loop body
LE: loop exit
PB: predicated region body
PF: predicated region fallthrough
CT: control target
= control target key end

     0   :  { %vm43_vm0 = vcmask 261120   ;;  %v822_v6 = vmov 0.0   ;;  %vm823_vm1 = vmmov 0   ;;  %s1150_s0 = inlined_call_operand.vmem [shape: f32[2,64,32], index: 0, kind: input, shape index: {}]   ;;  %s1151_s1 = inlined_call_operand.vmem [shape: f32[2,1,32], index: 1, kind: input, shape index: {}]   ;;  %s1152_s2 = inlined_call_operand.vmem [shape: f32[32,64], index: 2, kind: input, shape index: {}]   ;;  %s1153_s3 = inlined_call_operand.vmem [shape: f32[1,64], index: 3, kind: input, shape index: {}]   ;;  %s1154_s4 = inlined_call_operand.vmem [shape: bf16[32,128], index: 4, kind: input, shape index: {}]   ;;  %s1155_s5 = inlined_call_operand.vmem [shape: f32[1,128], index: 5, kind: input, shape index: {}]   ;;  %s1156_s6 = inlined_call_operand.hbm [shape: f32[128,128], index: 6, kind: output, shape index: {}]  }
   0x1   :  { %v866_v0 = vld [vmem:[%s1150_s0] sm:$0xff]  ;;  %v876_v2 = vld [vmem:[%s1150_s0 + $0x8] sm:$0xff]  ;;  %706 = vmatprep.subr.mxu0 %v822_v6  ;;  %717 = vmatprep.subr.mxu1 %v822_v6  ;;  %v894_v9 = vld [vmem:[%s1150_s0 + $0x10] sm:$0xff] }
   0x2   :  { %v871_v1 = vld [vmem:[%s1150_s0 + $0x40] sm:$0xff]  ;;  %v126_v3 = vsel %vm43_vm0, %v866_v0, 0.0  ;;  %v885_v5 = vld [vmem:[%s1150_s0 + $0x48] sm:$0xff]  ;;  %v129_v7 = vsel %vm43_vm0, %v876_v2, 0.0  ;;  %v899_v10 = vld [vmem:[%s1150_s0 + $0x18] sm:$0xff]  ;;  %714 = vmatprep.mubr.msk.f32.mxu0 %vm823_vm1, %v822_v6  ;;  %725 = vmatprep.mubr.msk.f32.mxu1 %vm823_vm1, %v822_v6  ;;  %v132_v13 = vsel %vm43_vm0, %v894_v9, 0.0 }
   0x3   :  { %v351_v4 = vsel %vm43_vm0, %v871_v1, 0.0  ;;  %127 = vadd.xlane.f32.xlu0 %v126_v3  ;;  %v354_v8 = vsel %vm43_vm0, %v885_v5, 0.0  ;;  %v33_v11 = vld [vmem:[%s1152_s2 + $0x18] sm:$0xff]  ;;  %v32_v12 = vld [vmem:[%s1152_s2 + $0x10] sm:$0xff]  ;;  %v135_v14 = vsel %vm43_vm0, %v899_v10, 0.0  ;;  %v31_v18 = vld [vmem:[%s1152_s2 + $0x8] sm:$0xff] }
   0x4   :  { %352 = vadd.xlane.f32.xlu1 %v351_v4  ;;  %707 = vmatpush3.msra.mxu0 %v33_v11  ;;  %v914_v15 = vld [vmem:[%s1150_s0 + $0x50] sm:$0xff]  ;;  %v35_v16 = vld [vmem:[%s1151_s1] sm:$0x1]  ;;  %v922_v17 = vld [vmem:[%s1150_s0 + $0x58] sm:$0xff] }
   0x5   :  { %718 = vmatpush3.msra.mxu1 %v33_v11  ;;  %708 = vmatprep.subr.mxu0 %v822_v6  ;;  %v662_v19 = vmul.f32 -1.442695, %v35_v16  ;;  %v664_v20 = vld [vmem:[%s1151_s1 + $0x1] sm:$0x1] }
   0x6   :  { %719 = vmatprep.subr.mxu1 %v822_v6  ;;  %709 = vmatpush3.msra.mxu0 %v32_v12  ;;  %v665_v21 = vmul.f32 -1.442695, %v664_v20 }
   0x7   :  { %130 = vadd.xlane.f32.xlu0 %v129_v7  ;;  %720 = vmatpush3.msra.mxu1 %v32_v12  ;;  %760 = vpow2.f32 %v662_v19 }
   0x8   :  { %355 = vadd.xlane.f32.xlu1 %v354_v8  ;;  %710 = vmatprep.subr.mxu0 %v822_v6 }
   0x9   :  { %721 = vmatprep.subr.mxu1 %v822_v6 }
   0xa   :  { %11 = vsyncpa [#allocation3], 0  ;;  %v30_v22 = vld [vmem:[%s1152_s2] sm:$0xff]  ;;  %762 = vpow2.f32 %v665_v21  ;;  %v357_v23 = vsel %vm43_vm0, %v914_v15, 0.0  ;;  %v360_v24 = vsel %vm43_vm0, %v922_v17, 0.0  ;;  %711 = vmatpush3.msra.mxu0 %v31_v18  ;;  %722 = vmatpush3.msra.mxu1 %v31_v18  ;;  %v945_v26 = vld [vmem:[%s1150_s0 + $0x28] sm:$0xff] }
   0xb   :  { %133 = vadd.xlane.f32.xlu0 %v132_v13  ;;  %v940_v25 = vld [vmem:[%s1150_s0 + $0x20] sm:$0xff]  ;;  %712 = vmatprep.subr.mxu0 %v822_v6  ;;  %v141_v28 = vsel %vm43_vm0, %v945_v26, 0.0  ;;  %v959_v30 = vld [vmem:[%s1150_s0 + $0x68] sm:$0xff]  ;;  %v968_v33 = vld [vmem:[%s1150_s0 + $0x30] sm:$0xff] }
   0xc   :  { %136 = vadd.xlane.f32.xlu1 %v135_v14  ;;  %723 = vmatprep.subr.mxu1 %v822_v6  ;;  %v138_v27 = vsel %vm43_vm0, %v940_v25, 0.0  ;;  %v954_v29 = vld [vmem:[%s1150_s0 + $0x60] sm:$0xff]  ;;  %v366_v32 = vsel %vm43_vm0, %v959_v30, 0.0  ;;  %v973_v34 = vld [vmem:[%s1150_s0 + $0x38] sm:$0xff]  ;;  %v144_v37 = vsel %vm43_vm0, %v968_v33, 0.0  ;;  %v982_v40 = vld [vmem:[%s1150_s0 + $0x70] sm:$0xff] }
   0xd   :  { %713 = vmatpush3.msra.mxu0 %v30_v22  ;;  %724 = vmatpush3.msra.mxu1 %v30_v22  ;;  %v363_v31 = vsel %vm43_vm0, %v954_v29, 0.0  ;;  %v147_v38 = vsel %vm43_vm0, %v973_v34, 0.0  ;;  %v987_v41 = vld [vmem:[%s1150_s0 + $0x78] sm:$0xff]  ;;  %v369_v43 = vsel %vm43_vm0, %v982_v40, 0.0 }
   0xe   :  { %v372_v44 = vsel %vm43_vm0, %v987_v41, 0.0 }
   0xf   :  { %358 = vadd.xlane.f32.xlu0 %v357_v23 }
  0x10   :  { %361 = vadd.xlane.f32.xlu1 %v360_v24 }
  0x13   :  { %139 = vadd.xlane.f32.xlu0 %v138_v27 }
  0x14   :  { %142 = vadd.xlane.f32.xlu1 %v141_v28  ;;  %v761_v35 = vpop.eup %760 }
  0x15   :  { %v39_v39 = vadd.f32 1.0, %v761_v35 }
  0x17   :  { %364 = vadd.xlane.f32.xlu0 %v363_v31  ;;  %v763_v36 = vpop.eup %762  ;;  %764 = vrcp.f32 %v39_v39 }
  0x18   :  { %367 = vadd.xlane.f32.xlu1 %v366_v32  ;;  %v264_v42 = vadd.f32 1.0, %v763_v36 }
  0x1a   :  { %766 = vrcp.f32 %v264_v42 }
  0x1b   :  { %145 = vadd.xlane.f32.xlu0 %v144_v37 }
  0x1c   :  { %148 = vadd.xlane.f32.xlu1 %v147_v38 }
  0x1f   :  { %370 = vadd.xlane.f32.xlu0 %v369_v43 }
  0x20   :  { %373 = vadd.xlane.f32.xlu1 %v372_v44 }
  0x24   :  { %v765_v45 = vpop.eup %764 }
  0x25   :  { %v42_v47 = vmul.f32 %v765_v45, %v35_v16 }
  0x27   :  { %v767_v46 = vpop.eup %766  ;;  %715 = vmatmul.mubr.msk.f32.vlgmr.msra.gmra.mxu0 %vm43_vm0, %v42_v47 }
  0x28   :  { %v267_v48 = vmul.f32 %v767_v46, %v664_v20 }
  0x2a   :  { %726 = vmatmul.mubr.msk.f32.vlgmr.msra.gmra.mxu1 %vm43_vm0, %v267_v48 }
  0x8c   :  { %v128_v49 = vpop.xlane.xlu0 %127 }
  0x8d   :  { %v353_v50 = vpop.xlane.xlu1 %352  ;;  %v151_v51 = vmul.f32 0.03125, %v128_v49 }
  0x8e   :  { %v375_v52 = vmul.f32 0.03125, %v353_v50 }
  0x8f   :  { %v996_v53 = vsub.f32 %v866_v0, %v151_v51 }
  0x90   :  { %v999_v54 = vsub.f32 %v871_v1, %v375_v52  ;;  %v131_v55 = vpop.xlane.xlu0 %130 }
  0x91   :  { %v356_v56 = vpop.xlane.xlu1 %355  ;;  %v152_v57 = vmul.f32 0.03125, %v131_v55  ;;  %v167_v59 = vmul.f32 %v996_v53, %v996_v53 }
  0x92   :  { %v376_v58 = vmul.f32 0.03125, %v356_v56  ;;  %v391_v60 = vmul.f32 %v999_v54, %v999_v54 }
  0x93   :  { %v1006_v61 = vsub.f32 %v876_v2, %v152_v57  ;;  %v175_v63 = vsel %vm43_vm0, %v167_v59, 0.0 }
  0x94   :  { %v1009_v62 = vsub.f32 %v885_v5, %v376_v58  ;;  %176 = vadd.xlane.f32.xlu0 %v175_v63  ;;  %v134_v0 = vpop.xlane.xlu0 %133  ;;  %v399_v3 = vsel %vm43_vm0, %v391_v60, 0.0 }
  0x95   :  { %v137_v1 = vpop.xlane.xlu1 %136  ;;  %v153_v4 = vmul.f32 0.03125, %v134_v0  ;;  %v168_v7 = vmul.f32 %v1006_v61, %v1006_v61 }
  0x96   :  { %v154_v6 = vmul.f32 0.03125, %v137_v1  ;;  %v392_v8 = vmul.f32 %v1009_v62, %v1009_v62 }
  0x97   :  { %v1018_v2 = vsub.f32 %v894_v9, %v153_v4  ;;  %v178_v11 = vsel %vm43_vm0, %v168_v7, 0.0 }
  0x98   :  { %v1021_v5 = vsub.f32 %v899_v10, %v154_v6  ;;  %400 = vadd.xlane.f32.xlu0 %v399_v3  ;;  %179 = vadd.xlane.f32.xlu1 %v178_v11  ;;  %v359_v12 = vpop.xlane.xlu0 %358  ;;  %v402_v14 = vsel %vm43_vm0, %v392_v8, 0.0  ;;  %v758_v8 = vld [vmem:[%s1154_s4 + $0x8] sm:$0xff]  }
  0x99   :  { %v362_v13 = vpop.xlane.xlu1 %361  ;;  %v377_v16 = vmul.f32 0.03125, %v359_v12  ;;  %v169_v19 = vmul.f32 %v1018_v2, %v1018_v2  ;;  %728 = vmatprep.subr.bf16.mxu0 %v758_v8  ;;  %748 = vmatprep.subr.bf16.mxu1 %v758_v8  ;;  %v759_v12 = vld [vmem:[%s1154_s4] sm:$0xff]   ;;  %s824_s4 = smov 96  }
  0x9a   :  { %v378_v18 = vmul.f32 0.03125, %v362_v13  ;;  %v170_v9 = vmul.f32 %v1021_v5, %v1021_v5  ;;  %729 = vmatpush3.bf16.msra.mxu0 %v758_v8  ;;  %750 = vmatpush3.bf16.msra.mxu1 %v758_v8  ;;  %v34_v13 = vld [vmem:[%s1153_s3] sm:$0x1] }
  0x9b   :  { %v1030_v20 = vsub.f32 %v914_v15, %v377_v16  ;;  %v181_v21 = vsel %vm43_vm0, %v169_v19, 0.0  ;;  %730 = vmatprep.subr.bf16.mxu0 %v759_v12  ;;  %749 = vmatprep.subr.bf16.mxu1 %v759_v12 }
  0x9c   :  { %v1033_v10 = vsub.f32 %v922_v17, %v378_v18  ;;  %403 = vadd.xlane.f32.xlu1 %v402_v14  ;;  %182 = vadd.xlane.f32.xlu0 %v181_v21  ;;  %v140_v22 = vpop.xlane.xlu0 %139  ;;  %v184_v24 = vsel %vm43_vm0, %v170_v9, 0.0 }
  0x9d   :  { %v143_v23 = vpop.xlane.xlu1 %142  ;;  %v155_v27 = vmul.f32 0.03125, %v140_v22  ;;  %v393_v31 = vmul.f32 %v1030_v20, %v1030_v20 }
  0x9e   :  { %v156_v28 = vmul.f32 0.03125, %v143_v23  ;;  %v394_v15 = vmul.f32 %v1033_v10, %v1033_v10  ;;  %731 = vmatpush3.bf16.msra.mxu0 %v759_v12  ;;  %751 = vmatpush3.bf16.msra.mxu1 %v759_v12 }
  0x9f   :  { %v1042_v32 = vsub.f32 %v940_v25, %v155_v27  ;;  %v405_v35 = vsel %vm43_vm0, %v393_v31, 0.0 }
  0xa0   :  { %v1045_v17 = vsub.f32 %v945_v26, %v156_v28  ;;  %185 = vadd.xlane.f32.xlu1 %v184_v24  ;;  %406 = vadd.xlane.f32.xlu0 %v405_v35  ;;  %v365_v36 = vpop.xlane.xlu0 %364  ;;  %v408_v38 = vsel %vm43_vm0, %v394_v15, 0.0 }
  0xa1   :  { %v368_v37 = vpop.xlane.xlu1 %367  ;;  %v379_v39 = vmul.f32 0.03125, %v365_v36  ;;  %v171_v43 = vmul.f32 %v1042_v32, %v1042_v32 }
  0xa2   :  { %v380_v42 = vmul.f32 0.03125, %v368_v37  ;;  %v172_v25 = vmul.f32 %v1045_v17, %v1045_v17 }
  0xa3   :  { %v1054_v44 = vsub.f32 %v954_v29, %v379_v39  ;;  %v187_v45 = vsel %vm43_vm0, %v171_v43, 0.0 }
  0xa4   :  { %v1057_v26 = vsub.f32 %v959_v30, %v380_v42  ;;  %409 = vadd.xlane.f32.xlu1 %v408_v38  ;;  %188 = vadd.xlane.f32.xlu0 %v187_v45  ;;  %v146_v46 = vpop.xlane.xlu0 %145  ;;  %v190_v48 = vsel %vm43_vm0, %v172_v25, 0.0 }
  0xa5   :  { %v149_v47 = vpop.xlane.xlu1 %148  ;;  %v157_v49 = vmul.f32 0.03125, %v146_v46  ;;  %v395_v51 = vmul.f32 %v1054_v44, %v1054_v44 }
  0xa6   :  { %v158_v50 = vmul.f32 0.03125, %v149_v47  ;;  %v396_v29 = vmul.f32 %v1057_v26, %v1057_v26 }
  0xa7   :  { %v1066_v52 = vsub.f32 %v968_v33, %v157_v49  ;;  %v411_v55 = vsel %vm43_vm0, %v395_v51, 0.0 }
  0xa8   :  { %v1069_v30 = vsub.f32 %v973_v34, %v158_v50  ;;  %191 = vadd.xlane.f32.xlu1 %v190_v48  ;;  %412 = vadd.xlane.f32.xlu0 %v411_v55  ;;  %v371_v56 = vpop.xlane.xlu0 %370  ;;  %v414_v58 = vsel %vm43_vm0, %v396_v29, 0.0 }
  0xa9   :  { %v374_v57 = vpop.xlane.xlu1 %373  ;;  %v381_v59 = vmul.f32 0.03125, %v371_v56  ;;  %v173_v63 = vmul.f32 %v1066_v52, %v1066_v52 }
  0xaa   :  { %v382_v60 = vmul.f32 0.03125, %v374_v57  ;;  %v174_v33 = vmul.f32 %v1069_v30, %v1069_v30 }
  0xab   :  { %v1078_v0 = vsub.f32 %v982_v40, %v381_v59  ;;  %v193_v1 = vsel %vm43_vm0, %v173_v63, 0.0 }
  0xac   :  { %v1081_v34 = vsub.f32 %v987_v41, %v382_v60  ;;  %415 = vadd.xlane.f32.xlu1 %v414_v58  ;;  %194 = vadd.xlane.f32.xlu0 %v193_v1  ;;  %v196_v3 = vsel %vm43_vm0, %v174_v33, 0.0  ;;  %v231_v41 = vlaneseq }
  0xad   :  { %v397_v4 = vmul.f32 %v1078_v0, %v1078_v0 }
  0xae   :  { %v398_v6 = vmul.f32 %v1081_v34, %v1081_v34  ;;  %v232_v11 = vshrl.u32 %v231_v41, 7 }
  0xaf   :  { %v417_v7 = vsel %vm43_vm0, %v397_v4, 0.0 }
  0xb0   :  { %197 = vadd.xlane.f32.xlu1 %v196_v3  ;;  %418 = vadd.xlane.f32.xlu0 %v417_v7  ;;  %v420_v40 = vsel %vm43_vm0, %v398_v6, 0.0  ;;  %v233_v14 = vsub.s32 0, %v232_v11 }
  0xb4   :  { %421 = vadd.xlane.f32.xlu1 %v420_v40 }
  0xe7   :  { %v113_v16 = vpop.f32.mrf.mxu0 }
  0xe8   :  { %v114_v18 = vadd.f32 %v113_v16, %v34_v13 }
  0xe9   :  { %v716_v21 = vpop.f32.mrf.mxu0 }
  0xea   :  { %v337_v19 = vpop.f32.mrf.mxu1  ;;  %v117_v22 = vadd.f32 1.0, %v114_v18  ;;  %v1100_v23 = vrot.slane %v114_v18, %v233_v14 }
  0xeb   :  { %v338_v9 = vadd.f32 %v337_v19, %v34_v13 }
  0xec   :  { %v727_v24 = vpop.f32.mrf.mxu1  ;;  %v234_v31 = vrot.slane %v117_v22, %v233_v14 }
  0xed   :  { %v341_v27 = vadd.f32 1.0, %v338_v9  ;;  %v1102_v28 = vrot.slane %v338_v9, %v233_v14 }
  0xee   :  { %236 = vrot.lane.b32.xlu0 %v234_v31, %s824_s4 }
  0xef   :  { %v458_v15 = vrot.slane %v341_v27, %v233_v14 }
  0xf1   :  { %460 = vrot.lane.b32.xlu1 %v458_v15, %s824_s4 }
 0x11d   :  { %v177_v35 = vpop.xlane.xlu0 %176 }
 0x11e   :  { %v199_v48 = vmul.f32 0.03125, %v177_v35 }
 0x120   :  { %v207_v55 = vadd.f32 1e-06, %v199_v48 }
 0x121   :  { %v180_v36 = vpop.xlane.xlu1 %179  ;;  %v401_v37 = vpop.xlane.xlu0 %400 }
 0x122   :  { %v200_v50 = vmul.f32 0.03125, %v180_v36  ;;  %v423_v51 = vmul.f32 0.03125, %v401_v37  ;;  %768 = vrsqrt.f32 %v207_v55 }
 0x124   :  { %v208_v57 = vadd.f32 1e-06, %v200_v50  ;;  %v431_v60 = vadd.f32 1e-06, %v423_v51 }
 0x125   :  { %v404_v38 = vpop.xlane.xlu1 %403  ;;  %v183_v39 = vpop.xlane.xlu0 %182 }
 0x126   :  { %v424_v29 = vmul.f32 0.03125, %v404_v38  ;;  %v201_v56 = vmul.f32 0.03125, %v183_v39  ;;  %770 = vrsqrt.f32 %v208_v57 }
 0x127   :  { %772 = vrsqrt.f32 %v431_v60 }
 0x128   :  { %v432_v1 = vadd.f32 1e-06, %v424_v29  ;;  %v209_v4 = vadd.f32 1e-06, %v201_v56 }
 0x129   :  { %v186_v42 = vpop.xlane.xlu1 %185  ;;  %v407_v43 = vpop.xlane.xlu0 %406 }
 0x12a   :  { %v202_v58 = vmul.f32 0.03125, %v186_v42  ;;  %v425_v63 = vmul.f32 0.03125, %v407_v43  ;;  %774 = vrsqrt.f32 %v432_v1 }
 0x12b   :  { %776 = vrsqrt.f32 %v209_v4 }
 0x12c   :  { %v210_v7 = vadd.f32 1e-06, %v202_v58  ;;  %v433_v41 = vadd.f32 1e-06, %v425_v63 }
 0x12d   :  { %v410_v25 = vpop.xlane.xlu1 %409  ;;  %v189_v45 = vpop.xlane.xlu0 %188 }
 0x12e   :  { %v426_v3 = vmul.f32 0.03125, %v410_v25  ;;  %v203_v6 = vmul.f32 0.03125, %v189_v45  ;;  %778 = vrsqrt.f32 %v210_v7 }
 0x12f   :  { %780 = vrsqrt.f32 %v433_v41  ;;  %v769_v37 = vpop.eup %768 }
 0x130   :  { %v434_v11 = vadd.f32 1e-06, %v426_v3  ;;  %v211_v14 = vadd.f32 1e-06, %v203_v6  ;;  %v223_v57 = vmul.f32 %v769_v37, %v996_v53 }
 0x131   :  { %v192_v46 = vpop.xlane.xlu1 %191  ;;  %v413_v47 = vpop.xlane.xlu0 %412 }
 0x132   :  { %v204_v40 = vmul.f32 0.03125, %v192_v46  ;;  %v427_v8 = vmul.f32 0.03125, %v413_v47  ;;  %782 = vrsqrt.f32 %v434_v11 }
 0x133   :  { %784 = vrsqrt.f32 %v211_v14  ;;  %v771_v38 = vpop.eup %770 }
 0x134   :  { %v212_v19 = vadd.f32 1e-06, %v204_v40  ;;  %v435_v21 = vadd.f32 1e-06, %v427_v8  ;;  %v773_v39 = vpop.eup %772  ;;  %v224_v58 = vmul.f32 %v771_v38, %v1006_v61 }
 0x135   :  { %v416_v49 = vpop.xlane.xlu1 %415  ;;  %v195_v59 = vpop.xlane.xlu0 %194 }
 0x136   :  { %v428_v12 = vmul.f32 0.03125, %v416_v49  ;;  %v205_v16 = vmul.f32 0.03125, %v195_v59  ;;  %786 = vrsqrt.f32 %v212_v19  ;;  %v447_v59 = vmul.f32 %v773_v39, %v999_v54 }
 0x137   :  { %788 = vrsqrt.f32 %v435_v21  ;;  %v775_v42 = vpop.eup %774 }
 0x138   :  { %v436_v24 = vadd.f32 1e-06, %v428_v12  ;;  %v213_v31 = vadd.f32 1e-06, %v205_v16  ;;  %v777_v43 = vpop.eup %776  ;;  %v448_v60 = vmul.f32 %v775_v42, %v1009_v62 }
 0x139   :  { %v198_v33 = vpop.xlane.xlu1 %197  ;;  %v419_v13 = vpop.xlane.xlu0 %418  ;;  %v225_v63 = vmul.f32 %v777_v43, %v1018_v2 }
 0x13a   :  { %v206_v9 = vmul.f32 0.03125, %v198_v33  ;;  %v429_v22 = vmul.f32 0.03125, %v419_v13  ;;  %790 = vrsqrt.f32 %v436_v24 }
 0x13b   :  { %792 = vrsqrt.f32 %v213_v31  ;;  %v779_v25 = vpop.eup %778 }
 0x13c   :  { %v214_v15 = vadd.f32 1e-06, %v206_v9  ;;  %v437_v35 = vadd.f32 1e-06, %v429_v22  ;;  %v781_v45 = vpop.eup %780  ;;  %v226_v33 = vmul.f32 %v779_v25, %v1021_v5 }
 0x13d   :  { %v422_v18 = vpop.xlane.xlu1 %421  ;;  %v449_v1 = vmul.f32 %v781_v45, %v1030_v20 }
 0x13e   :  { %v430_v27 = vmul.f32 0.03125, %v422_v18  ;;  %794 = vrsqrt.f32 %v214_v15 }
 0x13f   :  { %796 = vrsqrt.f32 %v437_v35  ;;  %v783_v46 = vpop.eup %782 }
 0x140   :  { %v438_v36 = vadd.f32 1e-06, %v430_v27  ;;  %v785_v47 = vpop.eup %784  ;;  %v450_v3 = vmul.f32 %v783_v46, %v1033_v10 }
 0x141   :  { %v227_v4 = vmul.f32 %v785_v47, %v1042_v32 }
 0x142   :  { %798 = vrsqrt.f32 %v438_v36 }
 0x143   :  { %v787_v48 = vpop.eup %786 }
 0x144   :  { %v789_v49 = vpop.eup %788  ;;  %v228_v6 = vmul.f32 %v787_v48, %v1045_v17 }
 0x145   :  { %v451_v53 = vmul.f32 %v789_v49, %v1054_v44 }
 0x147   :  { %v791_v50 = vpop.eup %790 }
 0x148   :  { %v793_v51 = vpop.eup %792  ;;  %v452_v61 = vmul.f32 %v791_v50, %v1057_v26 }
 0x149   :  { %v229_v54 = vmul.f32 %v793_v51, %v1066_v52  ;;  %v675_v51 = vld [vmem:[%s1155_s5] ss:$0 sm:$0xff]  ;;  %s825_s5 = smov [#allocation2]  }
 0x14a   :  { %s651_s21 = sshll.u32 %s825_s5, 4  ;;  %s652_s21 = int_to_ptr.vmem [resolvable:$true] %s651_s21 }
 0x14b   :  { %v795_v29 = vpop.eup %794  ;;  %s800_s22 = scalar_lea.vmem %s652_s21, 2048  ;;  %p805_p1 = scmp.lt.s32.totalorder %s652_s21, %s652_s21 }
 0x14c   :  { %v797_v55 = vpop.eup %796  ;;  %v230_v62 = vmul.f32 %v795_v29, %v1069_v30  ;;  %p801_p0 = scmp.ne.s32.totalorder %s652_s21, %s800_s22  ;;  %p806_p2 = scmp.lt.s32.totalorder %s800_s22, %s800_s22 }
 0x14d   :  { %v453_v2 = vmul.f32 %v797_v55, %v1078_v0 }
 0x14e   :  { %p807_p3 = por %p806_p2, %p805_p1 }
 0x14f   :  { %v799_v56 = vpop.eup %798 }
 0x150   :  { %v454_v5 = vmul.f32 %v799_v56, %v1081_v34  ;;  %p808_p4 = pnand %p807_p3, %p801_p0 }
 0x160   :  { %v237_v7 = vpop.permute.xlu0 %236 }
 0x161   :  { %v241_v40 = vmul.f32 %v237_v7, %v225_v63  ;;  %v242_v10 = vmul.f32 %v237_v7, %v226_v33  ;;  %v239_v41 = vmul.f32 %v237_v7, %v223_v57  ;;  %v240_v32 = vmul.f32 %v237_v7, %v224_v58 }
 0x162   :  { %v243_v19 = vmul.f32 %v237_v7, %v227_v4  ;;  %v244_v9 = vmul.f32 %v237_v7, %v228_v6  ;;  %v245_v35 = vmul.f32 %v237_v7, %v229_v54  ;;  %v246_v36 = vmul.f32 %v237_v7, %v230_v62 }
 0x163   :  { %v461_v20 = vpop.permute.xlu1 %460  ;;  %v251_v26 = vadd.f32 %v1100_v23, %v239_v41  ;;  %v252_v12 = vadd.f32 %v1100_v23, %v240_v32  ;;  %v253_v52 = vadd.f32 %v1100_v23, %v241_v40  ;;  %v254_v30 = vadd.f32 %v1100_v23, %v242_v10 }
 0x164   :  { %v465_v8 = vmul.f32 %v461_v20, %v449_v1  ;;  %v466_v17 = vmul.f32 %v461_v20, %v450_v3  ;;  %v463_v11 = vmul.f32 %v461_v20, %v447_v59  ;;  %v464_v44 = vmul.f32 %v461_v20, %v448_v60 }
 0x165   :  { %v483_v16 = vpack.c.bf16 %v252_v12, %v251_v26  ;;  %v484_v18 = vpack.c.bf16 %v254_v30, %v253_v52  ;;  %v467_v24 = vmul.f32 %v461_v20, %v451_v53  ;;  %v468_v27 = vmul.f32 %v461_v20, %v452_v61 }
 0x166   :  { %v475_v0 = vadd.f32 %v1102_v28, %v463_v11  ;;  %v476_v34 = vadd.f32 %v1102_v28, %v464_v44  ;;  %v477_v13 = vadd.f32 %v1102_v28, %v465_v8  ;;  %v478_v14 = vadd.f32 %v1102_v28, %v466_v17 }
 0x167   :  { %732 = vmatprep.mubr.msk.bf16.mxu0 %vm43_vm0, %v483_v16  ;;  %v255_v31 = vadd.f32 %v1100_v23, %v243_v19  ;;  %v256_v15 = vadd.f32 %v1100_v23, %v244_v9  ;;  %v479_v37 = vadd.f32 %v1102_v28, %v467_v24  ;;  %v480_v38 = vadd.f32 %v1102_v28, %v468_v27 }
 0x168   :  { %v487_v21 = vpack.c.bf16 %v476_v34, %v475_v0  ;;  %v488_v22 = vpack.c.bf16 %v478_v14, %v477_v13  ;;  %733 = vmatmul.mubr.msk.bf16.vlgmr.msra.gmra.mxu0 %vm43_vm0, %v484_v18  ;;  %v469_v39 = vmul.f32 %v461_v20, %v453_v2  ;;  %v470_v43 = vmul.f32 %v461_v20, %v454_v5 }
 0x169   :  { %v485_v42 = vpack.c.bf16 %v256_v15, %v255_v31  ;;  %v489_v25 = vpack.c.bf16 %v480_v38, %v479_v37  ;;  %v257_v45 = vadd.f32 %v1100_v23, %v245_v35  ;;  %v258_v46 = vadd.f32 %v1100_v23, %v246_v36 }
 0x16a   :  { %740 = vmatprep.mubr.msk.bf16.mxu1 %vm43_vm0, %v487_v21  ;;  %v481_v47 = vadd.f32 %v1102_v28, %v469_v39  ;;  %v482_v48 = vadd.f32 %v1102_v28, %v470_v43 }
 0x16b   :  { %741 = vmatmul.mubr.msk.bf16.vlgmr.msra.gmra.mxu1 %vm43_vm0, %v488_v22  ;;  %736 = vmatprep.mubr.msk.bf16.mxu0 %vm43_vm0, %v485_v42  ;;  %v486_v49 = vpack.c.bf16 %v258_v46, %v257_v45 }
 0x16c   :  { %744 = vmatprep.mubr.msk.bf16.mxu1 %vm43_vm0, %v489_v25  ;;  %v490_v50 = vpack.c.bf16 %v482_v48, %v481_v47 }
 0x170   :  { %737 = vmatmul.mubr.msk.bf16.gmra.mxu0 %vm43_vm0, %v486_v49 }
 0x173   :  { %745 = vmatmul.mubr.msk.bf16.gmra.mxu1 %vm43_vm0, %v490_v50 }
 0x228   :  { %v734_v29 = vpop.f32.mrf.mxu0 }
 0x229   :  { %v576_v23 = vadd.f32 %v734_v29, %v675_v51 }
 0x22a   :  { %v567_v57 = vpop.f32.mrf.mxu0 }
 0x22b   :  { %v742_v55 = vpop.f32.mrf.mxu1  ;;  %632 = vst [vmem:[#allocation2 + $0x10] sm:$0xff] %v576_v23  ;;  %v568_v58 = vadd.f32 %v675_v51, %v567_v57 }
 0x22c   :  { %v608_v56 = vadd.f32 %v742_v55, %v675_v51  ;;  %v735_v60 = vpop.f32.mrf.mxu0 }
 0x22d   :  { %v599_v28 = vpop.f32.mrf.mxu1  ;;  %630 = vst [vmem:[#allocation2] sm:$0xff] %v568_v58  ;;  %v579_v63 = vadd.f32 %v735_v60, %v675_v51 }
 0x22e   :  { %640 = vst [vmem:[#allocation2 + $0x50] sm:$0xff] %v608_v56  ;;  %v600_v59 = vadd.f32 %v675_v51, %v599_v28  ;;  %v570_v3 = vpop.f32.mrf.mxu0 }
 0x22f   :  { %v743_v33 = vpop.f32.mrf.mxu1  ;;  %633 = vst [vmem:[#allocation2 + $0x18] sm:$0xff] %v579_v63  ;;  %v571_v4 = vadd.f32 %v675_v51, %v570_v3 }
 0x230   :  { %638 = vst [vmem:[#allocation2 + $0x40] sm:$0xff] %v600_v59  ;;  %v611_v1 = vadd.f32 %v743_v33, %v675_v51  ;;  %v738_v61 = vpop.f32.mrf.mxu0 }
 0x231   :  { %v602_v6 = vpop.f32.mrf.mxu1  ;;  %631 = vst [vmem:[#allocation2 + $0x8] sm:$0xff] %v571_v4  ;;  %v592_v7 = vadd.f32 %v738_v61, %v675_v51 }
 0x232   :  { %641 = vst [vmem:[#allocation2 + $0x58] sm:$0xff] %v611_v1  ;;  %v603_v53 = vadd.f32 %v675_v51, %v602_v6  ;;  %v583_v2 = vpop.f32.mrf.mxu0 }
 0x233   :  { %v746_v54 = vpop.f32.mrf.mxu1  ;;  %636 = vst [vmem:[#allocation2 + $0x30] sm:$0xff] %v592_v7  ;;  %v584_v5 = vadd.f32 %v675_v51, %v583_v2 }
 0x234   :  { %639 = vst [vmem:[#allocation2 + $0x48] sm:$0xff] %v603_v53  ;;  %v624_v62 = vadd.f32 %v746_v54, %v675_v51  ;;  %v739_v10 = vpop.f32.mrf.mxu0 }
 0x235   :  { %v615_v20 = vpop.f32.mrf.mxu1  ;;  %634 = vst [vmem:[#allocation2 + $0x20] sm:$0xff] %v584_v5  ;;  %v595_v41 = vadd.f32 %v739_v10, %v675_v51 }
 0x236   :  { %644 = vst [vmem:[#allocation2 + $0x70] sm:$0xff] %v624_v62  ;;  %v616_v40 = vadd.f32 %v675_v51, %v615_v20  ;;  %v586_v17 = vpop.f32.mrf.mxu0 }
 0x237   :  { %v747_v32 = vpop.f32.mrf.mxu1  ;;  %637 = vst [vmem:[#allocation2 + $0x38] sm:$0xff] %v595_v41  ;;  %v587_v11 = vadd.f32 %v675_v51, %v586_v17 }
 0x238   :  { %642 = vst [vmem:[#allocation2 + $0x60] sm:$0xff] %v616_v40  ;;  %v627_v8 = vadd.f32 %v747_v32, %v675_v51 }
 0x239   :  { %v618_v44 = vpop.f32.mrf.mxu1  ;;  %635 = vst [vmem:[#allocation2 + $0x28] sm:$0xff] %v587_v11 }
 0x23a   :  { %645 = vst [vmem:[#allocation2 + $0x78] sm:$0xff] %v627_v8  ;;  %v619_v26 = vadd.f32 %v675_v51, %v618_v44 }
 0x23c   :  { %643 = vst [vmem:[#allocation2 + $0x68] sm:$0xff] %v619_v26 }
 0x23d   :  { %811 = shalt.err (!%p808_p4)
}
 0x23e   :  { %s826_s23 = smov 128   ;;  %s827_s24 = smov 8  }
 0x23f   :  { %657 = dma.vmem_to_hbm [thread:$0]  %s652_s21, 2048, %s1156_s6, [#allocation3], %s826_s23, %s826_s23, %s827_s24  }
 0x240   :  { %820 = dma.done.wait [#allocation3], 2048  }
 0x241   :  { %821 = vsyncadd [#allocation3], 4294965248 }
 0x242   :  { %661 = vsyncpa [#allocation3], 1 }

</bundles_post_ra>
